<compile_context>
chip_gen: v7x
topology: tpu7x:2x2x1
jax: 0.10.0
libtpu: 0.0.40
codegen_flags: <defaults>
</compile_context>

<pallas_src>
import jax
import jax.numpy as jnp
from jax.experimental import pallas as pl
from jax.experimental.pallas import tpu as pltpu


def _increment_kernel(x_ref, o_ref):
    # x_ref, o_ref: (1,) int32 refs in SMEM (aliased).  Single scalar-ALU add.
    o_ref[0] = x_ref[0] + 1


def _increment_by_kernel(x_ref, n_ref, o_ref):
    # Fused variant: advance the counter by n in one launch.
    o_ref[0] = x_ref[0] + n_ref[0]


# Build + jit the pallas_call callables exactly once (cached lowering, cheap
# dispatch on every subsequent call).
_INC1 = jax.jit(
    pl.pallas_call(
        _increment_kernel,
        out_shape=jax.ShapeDtypeStruct((1,), jnp.int32),
        in_specs=[pl.BlockSpec(memory_space=pltpu.SMEM)],
        out_specs=pl.BlockSpec(memory_space=pltpu.SMEM),
        input_output_aliases={0: 0},  # in-place update of the counter buffer
    ),
    donate_argnums=0,
)

_INC_N = jax.jit(
    pl.pallas_call(
        _increment_by_kernel,
        out_shape=jax.ShapeDtypeStruct((1,), jnp.int32),
        in_specs=[
            pl.BlockSpec(memory_space=pltpu.SMEM),
            pl.BlockSpec(memory_space=pltpu.SMEM),
        ],
        out_specs=pl.BlockSpec(memory_space=pltpu.SMEM),
        input_output_aliases={0: 0},  # counter aliased; step count is read-only
    ),
    donate_argnums=0,
)


class A:
    """JAX/Pallas port of the PyTorch module `A` (a stateful scalar counter)."""

    def __init__(self):
        # Mirrors `self.x: int = 0`.
        # Note: int32 counter wraps at 2**31-1 (Python ints are unbounded).
        self.x = jnp.zeros((1,), dtype=jnp.int32)

    def forward(self):
        # Mirrors `self.x += 1; return self.x`.  No host sync here — the
        # counter stays on device so consecutive calls can pipeline.
        self.x = _INC1(self.x)
        return self.x

    def advance(self, n: int):
        # Fused path: N sequential increments collapsed into one launch.
        self.x = _INC_N(self.x, jnp.array([n], dtype=jnp.int32))
        return self.x


if __name__ == "__main__":
    # forward() takes no tensor inputs; PRNGKey(0) is created only to satisfy
    # the deterministic-setup convention (nothing random exists here).
    _ = jax.random.PRNGKey(0)

    mod = A()

    # Two single-step forwards (read each value BEFORE the next call donates
    # the underlying buffer).
    out1 = mod.forward()
    v1 = int(jax.block_until_ready(out1)[0])
    out2 = mod.forward()
    v2 = int(jax.block_until_ready(out2)[0])
    assert v1 == 1, f"expected 1, got {v1}"
    assert v2 == 2, f"expected 2, got {v2}"

    # Fused batch of 5 increments in a single kernel launch: 2 -> 7.
    out3 = mod.advance(5)
    v3 = int(jax.block_until_ready(out3)[0])
    assert v3 == 7, f"expected 7, got {v3}"

    # Hot loop: no per-call host sync, single sync at the end: 7 -> 10.
    last = out3
    for _ in range(3):
        last = mod.forward()
    last = jax.block_until_ready(last)
    assert int(last[0]) == 10, f"expected 10, got {int(last[0])}"

    print("KERNEL_OK")
</pallas_src>

<mosaic_0001>
module attributes {stable_mosaic.version = 11 : i64} {
  func.func @_increment_kernel(%arg0: memref<1xi32, #tpu.memory_space<smem>>, %arg1: memref<1xi32, #tpu.memory_space<smem>>) attributes {dimension_semantics = [], scalar_prefetch = 0 : i64, scratch_operands = 0 : i64, tpu.core_type = #tpu.core_type<tc>} {
    %c0 = arith.constant 0 : index
    %0 = memref.load %arg0[%c0] : memref<1xi32, #tpu.memory_space<smem>>
    %c1_i32 = arith.constant 1 : i32
    %1 = arith.addi %0, %c1_i32 : i32
    %c0_0 = arith.constant 0 : index
    %2 = memref.load %arg1[%c0_0] : memref<1xi32, #tpu.memory_space<smem>>
    memref.store %1, %arg1[%c0_0] : memref<1xi32, #tpu.memory_space<smem>>
    return
  }
}

</mosaic_0001>

<bundles_post_ra>
// kernel: tpu_custom_call.1
= control target key start
LH: loop header
LB: loop body
LE: loop exit
PB: predicated region body
PF: predicated region fallthrough
CT: control target
= control target key end

     0   :  { %7 = vsyncpa [#allocation4], 0  ;;  %s66_s0 = inlined_call_operand.<no memory space> [shape: s32[1], index: 0, kind: input, shape index: {}, may-alias: {0,1}]   ;;  %s67_s1 = inlined_call_operand.hbm [shape: s32[1], index: 1, kind: output, shape index: {}, may-alias: {0,1}]  }
   0x1   :  { %s11_s8 = sadd.s32 1, %s66_s0  ;;  %s28_s11 = scalar_lea.hbm %s67_s1, 16 }
   0x2   :  { %13 = sst [smem:[#allocation3]] %s11_s8  ;;  %p29_p0 = scmp.ne.s32.totalorder %s67_s1, %s28_s11 }
   0x3   :  { %p32_p1 = scmp.lt.u32.totalorder %s28_s11, %s67_s1 }
   0x5   :  { %p34_p2 = pnand %p32_p1, %p29_p0 }
   0x7   :  { %37 = shalt.err (!%p34_p2)
}
   0x8   :  { %s40_s16 = smov [#allocation3]  }
   0x9   :  { %21 = dma.smem_to_hbm %s40_s16, 16, %s67_s1, [#allocation4]  }
   0xa   :  { %38 = dma.done.wait [#allocation4], 16  }
   0xb   :  { %39 = vsyncadd [#allocation4], 4294967280 }
   0xc   :  { %25 = sfence }
   0xd   :  { %26 = vsyncpa [#allocation4], 1 }

</bundles_post_ra>
